<compile_context>
chip_gen: v5e
topology: v5e:2x2
jax: 0.10.0
libtpu: 0.0.40
codegen_flags: <defaults>
</compile_context>

<pallas_src>
import jax
import jax.numpy as jnp
from jax.experimental import pallas as pl
from jax.experimental.pallas import tpu as pltpu

_LANES = 128  # TPU vreg lane width


def _small_block_kernel(x_ref, w_ref, b_ref, o_ref):
    # x_ref: (TBR, 128, nInput) VMEM    w_ref: (1, nInput) VMEM
    # b_ref: (1,) SMEM                  o_ref: (TBR, 128)   VMEM (lane-dense)
    x = x_ref[...]
    w = w_ref[...]                        # (1, nInput) -> broadcasts over (TBR, 128, nInput)
    b = b_ref[0]                          # scalar bias from SMEM
    # VPU multiply + cross-lane reduce over the feature axis (no MXU for N=1).
    y = jnp.sum(x * w, axis=-1) + b       # (TBR, 128)
    # LeakyReLU(negative_slope=0.1)
    y = jnp.where(y >= 0, y, 0.1 * y)
    o_ref[...] = y.astype(o_ref.dtype)


def small_block_forward(x, weight, bias, *, block_rows=64):
    """x: (B, nInput); weight: (1, nInput) (PyTorch Linear layout); bias: (1,)."""
    B, n_input = x.shape

    # Number of 128-sample "lane rows" needed to hold the batch.
    rows = pl.cdiv(B, _LANES)
    tbr = max(1, min(block_rows, rows))          # rows per grid step (8192 samples default)
    rows_pad = pl.cdiv(rows, tbr) * tbr
    b_pad = rows_pad * _LANES

    if b_pad != B:
        x = jnp.pad(x, ((0, b_pad - B), (0, 0)))
    # Free reshape (row-major contiguous): 128 samples per lane-row.
    x3 = x.reshape(rows_pad, _LANES, n_input)

    w2d = weight.reshape(1, n_input).astype(x.dtype)
    b1d = bias.reshape(1).astype(x.dtype)

    cost = pl.CostEstimate(
        flops=2 * B * n_input,
        transcendentals=0,
        bytes_accessed=4 * (B * n_input + n_input + 1 + B),
    )

    out = pl.pallas_call(
        _small_block_kernel,
        out_shape=jax.ShapeDtypeStruct((rows_pad, _LANES), x.dtype),
        grid=(rows_pad // tbr,),
        in_specs=[
            pl.BlockSpec((tbr, _LANES, n_input), lambda i: (i, 0, 0)),
            pl.BlockSpec((1, n_input), lambda i: (0, 0)),
            pl.BlockSpec(memory_space=pltpu.MemorySpace.SMEM),
        ],
        out_specs=pl.BlockSpec((tbr, _LANES), lambda i: (i, 0)),
        compiler_params=pltpu.CompilerParams(
            dimension_semantics=("parallel",),
        ),
        cost_estimate=cost,
    )(x3, w2d, b1d)

    # Lane-dense (rows_pad, 128) slab -> logical (B, 1); padded rows are dropped.
    return out.reshape(b_pad)[:B].reshape(B, 1)


def _reference(x, weight, bias):
    y = x @ weight.T + bias
    return jnp.where(y >= 0, y, 0.1 * y)


if __name__ == "__main__":
    key = jax.random.PRNGKey(0)
    k_x, k_w, k_b, k_x2 = jax.random.split(key, 4)

    batch = 8
    n_input = 32

    # Deterministic parameter init (mimics PyTorch Linear's uniform(-1/sqrt(n), 1/sqrt(n)))
    bound = 1.0 / jnp.sqrt(jnp.float32(n_input))
    weight = jax.random.uniform(k_w, (1, n_input), jnp.float32, -bound, bound)
    bias = jax.random.uniform(k_b, (1,), jnp.float32, -bound, bound)

    # Small shape (single tile, padded to one 128-sample lane-row).
    x = jax.random.normal(k_x, (batch, n_input), jnp.float32)
    out = jax.block_until_ready(small_block_forward(x, weight, bias))
    ref = _reference(x, weight, bias)
    assert out.shape == (batch, 1)
    assert jnp.allclose(out, ref, atol=1e-5, rtol=1e-5)

    # Larger ragged shape: exercises the tiled / double-buffered multi-step path.
    batch2 = 128 * 96 + 5
    x2 = jax.random.normal(k_x2, (batch2, n_input), jnp.float32)
    out2 = jax.block_until_ready(small_block_forward(x2, weight, bias))
    ref2 = _reference(x2, weight, bias)
    assert out2.shape == (batch2, 1)
    assert jnp.allclose(out2, ref2, atol=1e-5, rtol=1e-5)

    print("KERNEL_OK")
</pallas_src>

<mosaic_0001>
module attributes {stable_mosaic.version = 11 : i64} {
  func.func @_small_block_kernel(%arg0: i32, %arg1: memref<1x128x32xf32, #tpu.memory_space<vmem>>, %arg2: memref<1x32xf32, #tpu.memory_space<vmem>>, %arg3: memref<1xf32, #tpu.memory_space<smem>>, %arg4: memref<1x128xf32, #tpu.memory_space<vmem>>) attributes {dimension_semantics = [#tpu.dimension_semantics<parallel>], iteration_bounds = array<i64: 1>, scalar_prefetch = 0 : i64, scratch_operands = 0 : i64, tpu.core_type = #tpu.core_type<tc>, window_params = [{transform_indices = @transform_0, window_bounds = array<i64: 1, 128, 32>}, {pipeline_mode = #tpu.pipeline_mode<synchronous>, transform_indices = @transform_1, window_bounds = array<i64: 1, 32>}, {transform_indices = @transform_2, window_bounds = array<i64: 1>}, {transform_indices = @transform_3, window_bounds = array<i64: 1, 128>}]} {
    %c0 = arith.constant 0 : index
    %c0_0 = arith.constant 0 : index
    %c0_1 = arith.constant 0 : index
    %0 = vector.load %arg1[%c0, %c0_0, %c0_1] : memref<1x128x32xf32, #tpu.memory_space<vmem>>, vector<1x128x32xf32>
    %c0_2 = arith.constant 0 : index
    %c0_3 = arith.constant 0 : index
    %1 = vector.load %arg2[%c0_2, %c0_3] : memref<1x32xf32, #tpu.memory_space<vmem>>, vector<1x32xf32>
    %c0_4 = arith.constant 0 : index
    %2 = memref.load %arg3[%c0_4] : memref<1xf32, #tpu.memory_space<smem>>
    %3 = vector.shape_cast %1 : vector<1x32xf32> to vector<1x1x32xf32>
    %4 = vector.broadcast %3 : vector<1x1x32xf32> to vector<1x128x32xf32>
    %5 = arith.mulf %0, %4 : vector<1x128x32xf32>
    %cst = arith.constant dense<0.000000e+00> : vector<1x128xf32>
    %6 = vector.multi_reduction <add>, %5, %cst [2] : vector<1x128x32xf32> to vector<1x128xf32>
    %7 = vector.broadcast %2 : f32 to vector<1x128xf32>
    %8 = arith.addf %6, %7 : vector<1x128xf32>
    %cst_5 = arith.constant 0.000000e+00 : f32
    %9 = vector.broadcast %cst_5 : f32 to vector<1x128xf32>
    %10 = arith.cmpf oge, %8, %9 : vector<1x128xf32>
    %cst_6 = arith.constant 1.000000e-01 : f32
    %11 = vector.broadcast %cst_6 : f32 to vector<1x128xf32>
    %12 = arith.mulf %11, %8 : vector<1x128xf32>
    %13 = arith.select %10, %8, %12 : vector<1x128xi1>, vector<1x128xf32>
    %c0_7 = arith.constant 0 : index
    %c0_8 = arith.constant 0 : index
    %14 = vector.load %arg4[%c0_7, %c0_8] : memref<1x128xf32, #tpu.memory_space<vmem>>, vector<1x128xf32>
    tpu.vector_store %arg4[%c0_7, %c0_8], %13 {strides = array<i32>} : memref<1x128xf32, #tpu.memory_space<vmem>>, vector<1x128xf32>,
    return
  }
  func.func @transform_0(%arg0: i32) -> (i32, i32, i32) {
    %c0_i32 = arith.constant 0 : i32
    %c0_i32_0 = arith.constant 0 : i32
    %c0_i32_1 = arith.constant 0 : i32
    return %arg0, %c0_i32, %c0_i32_0 : i32, i32, i32
  }
  func.func @transform_1(%arg0: i32) -> (i32, i32) {
    %c0_i32 = arith.constant 0 : i32
    %c0_i32_0 = arith.constant 0 : i32
    %c0_i32_1 = arith.constant 0 : i32
    return %c0_i32, %c0_i32_0 : i32, i32
  }
  func.func @transform_2(%arg0: i32) -> i32 {
    %c0_i32 = arith.constant 0 : i32
    %c0_i32_0 = arith.constant 0 : i32
    return %c0_i32 : i32
  }
  func.func @transform_3(%arg0: i32) -> (i32, i32) {
    %c0_i32 = arith.constant 0 : i32
    %c0_i32_0 = arith.constant 0 : i32
    return %arg0, %c0_i32 : i32, i32
  }
}

</mosaic_0001>

<bundles_post_ra>
// kernel: tpu_custom_call.1
= control target key start
LH: loop header
LB: loop body
LE: loop exit
PB: predicated region body
PF: predicated region fallthrough
CT: control target
= control target key end

     0   :  { %vm53_vm0 = vcmask 261120   ;;  %s441_s0 = inlined_call_operand.vmem [shape: f32[1,128,32], index: 0, kind: input, shape index: {}]   ;;  %s442_s1 = inlined_call_operand.vmem [shape: f32[1,32], index: 1, kind: input, shape index: {}]   ;;  %s443_s2 = inlined_call_operand.<no memory space> [shape: f32[1], index: 2, kind: input, shape index: {}]   ;;  %s444_s3 = inlined_call_operand.hbm [shape: f32[1,128], index: 3, kind: output, shape index: {}]  }
   0x1   :  { %v16_v0 = vld [vmem:[%s441_s0] sm:$0xff]  ;;  %v18_v2 = vld [vmem:[%s441_s0 + $0x10] sm:$0xff]  ;;  %v17_v7 = vld [vmem:[%s441_s0 + $0x8] sm:$0xff] }
   0x2   :  { %v319_v1 = vld [vmem:[%s442_s1] ss:$0 sm:$0xff]  ;;  %v19_v8 = vld [vmem:[%s441_s0 + $0x18] sm:$0xff]  ;;  %v21_v12 = vld [vmem:[%s441_s0 + $0x28] sm:$0xff] }
   0x3   :  { %v20_v3 = vld [vmem:[%s441_s0 + $0x20] sm:$0xff]  ;;  %v37_v4 = vmul.f32 %v319_v1, %v16_v0  ;;  %v39_v5 = vmul.f32 %v319_v1, %v18_v2  ;;  %v38_v13 = vmul.f32 %v319_v1, %v17_v7  ;;  %v40_v14 = vmul.f32 %v319_v1, %v19_v8 }
   0x4   :  { %v41_v6 = vmul.f32 %v319_v1, %v20_v3 }
   0x5   :  { %v54_v9 = vsel %vm53_vm0, %v37_v4, 0.0  ;;  %v60_v10 = vsel %vm53_vm0, %v39_v5, 0.0 }
   0x6   :  { %v66_v11 = vsel %vm53_vm0, %v41_v6, 0.0  ;;  %55 = vadd.xlane.f32.xlu0 %v54_v9  ;;  %61 = vadd.xlane.f32.xlu1 %v60_v10 }
   0x7   :  { %67 = vadd.xlane.f32.xlu2 %v66_v11 }
   0x8   :  { %9 = vsyncpa [#allocation4], 0  ;;  %v42_v15 = vmul.f32 %v319_v1, %v21_v12  ;;  %v57_v16 = vsel %vm53_vm0, %v38_v13, 0.0  ;;  %v63_v17 = vsel %vm53_vm0, %v40_v14, 0.0  ;;  %v22_v19 = vld [vmem:[%s441_s0 + $0x30] sm:$0xff]  ;;  %v23_v20 = vld [vmem:[%s441_s0 + $0x38] sm:$0xff]  ;;  %v401_v49 = vstv %s443_s2 }
   0x9   :  { %v24_v21 = vld [vmem:[%s441_s0 + $0x40] sm:$0xff]  ;;  %v43_v22 = vmul.f32 %v319_v1, %v22_v19  ;;  %v44_v23 = vmul.f32 %v319_v1, %v23_v20  ;;  %v25_v28 = vld [vmem:[%s441_s0 + $0x48] sm:$0xff]  ;;  %v26_v29 = vld [vmem:[%s441_s0 + $0x50] sm:$0xff]  ;;  %v183_v54 = vlaneseq  ;;  %vm188_vm5 = vcmask 130112   ;;  %s255_s1 = sshll.u32 %s444_s3, 4  ;;  %s256_s1 = int_to_ptr.hbm [resolvable:$true] %s255_s1 }
   0xa   :  { %v69_v18 = vsel %vm53_vm0, %v42_v15, 0.0  ;;  %v45_v24 = vmul.f32 %v319_v1, %v24_v21  ;;  %v27_v30 = vld [vmem:[%s441_s0 + $0x58] sm:$0xff]  ;;  %v46_v31 = vmul.f32 %v319_v1, %v25_v28  ;;  %v47_v32 = vmul.f32 %v319_v1, %v26_v29  ;;  %v28_v37 = vld [vmem:[%s441_s0 + $0x60] sm:$0xff]  ;;  %v29_v38 = vld [vmem:[%s441_s0 + $0x68] sm:$0xff] }
   0xb   :  { %v72_v25 = vsel %vm53_vm0, %v43_v22, 0.0  ;;  %v75_v26 = vsel %vm53_vm0, %v44_v23, 0.0  ;;  %v48_v33 = vmul.f32 %v319_v1, %v27_v30  ;;  %v30_v39 = vld [vmem:[%s441_s0 + $0x70] sm:$0xff]  ;;  %v49_v40 = vmul.f32 %v319_v1, %v28_v37  ;;  %v31_v46 = vld [vmem:[%s441_s0 + $0x78] sm:$0xff]  ;;  %s292_s0 = smov [#allocation3]  }
   0xc   :  { %v78_v27 = vsel %vm53_vm0, %v45_v24, 0.0  ;;  %v81_v34 = vsel %vm53_vm0, %v46_v31, 0.0  ;;  %v84_v35 = vsel %vm53_vm0, %v47_v32, 0.0  ;;  %v50_v41 = vmul.f32 %v319_v1, %v29_v38  ;;  %s253_s2 = sshll.u32 %s292_s0, 4  ;;  %s254_s2 = int_to_ptr.vmem [resolvable:$true] %s253_s2 }
   0xd   :  { %v87_v36 = vsel %vm53_vm0, %v48_v33, 0.0  ;;  %v51_v42 = vmul.f32 %v319_v1, %v30_v39  ;;  %v90_v43 = vsel %vm53_vm0, %v49_v40, 0.0  ;;  %v52_v47 = vmul.f32 %v319_v1, %v31_v46 }
   0xe   :  { %58 = vadd.xlane.f32.xlu0 %v57_v16  ;;  %64 = vadd.xlane.f32.xlu1 %v63_v17  ;;  %v93_v44 = vsel %vm53_vm0, %v50_v41, 0.0  ;;  %v405_v57 = vand.u32 127, %v183_v54  ;;  %vm192_vm6 = vcmask 195712   ;;  %vm196_vm9 = vcmask 261312  }
   0xf   :  { %70 = vadd.xlane.f32.xlu2 %v69_v18  ;;  %v96_v45 = vsel %vm53_vm0, %v51_v42, 0.0  ;;  %v99_v48 = vsel %vm53_vm0, %v52_v47, 0.0  ;;  %vm200_vm10 = vcmask 326912   ;;  %vm204_vm13 = vcmask 392512  }
  0x10   :  { %v190_v62 = vadd.s32 4294967280, %v405_v57  ;;  %v186_v3 = vadd.s32 4294967288, %v405_v57  ;;  %v194_v4 = vadd.s32 4294967272, %v405_v57  ;;  %v198_v17 = vadd.s32 4294967264, %v405_v57 }
  0x11   :  { %v202_v20 = vadd.s32 4294967256, %v405_v57  ;;  %v206_v29 = vadd.s32 4294967248, %v405_v57  ;;  %v210_v37 = vadd.s32 4294967240, %v405_v57  ;;  %vm208_vm15 = vcmask 458112  }
  0x12   :  { %v214_v42 = vadd.s32 4294967232, %v405_v57  ;;  %vm212_vm0 = vcmask 523712  }
  0x16   :  { %73 = vadd.xlane.f32.xlu0 %v72_v25  ;;  %76 = vadd.xlane.f32.xlu1 %v75_v26 }
  0x17   :  { %79 = vadd.xlane.f32.xlu2 %v78_v27 }
  0x1e   :  { %82 = vadd.xlane.f32.xlu0 %v81_v34  ;;  %85 = vadd.xlane.f32.xlu1 %v84_v35 }
  0x1f   :  { %88 = vadd.xlane.f32.xlu2 %v87_v36 }
  0x26   :  { %91 = vadd.xlane.f32.xlu0 %v90_v43  ;;  %94 = vadd.xlane.f32.xlu1 %v93_v44 }
  0x27   :  { %97 = vadd.xlane.f32.xlu2 %v96_v45 }
  0x2e   :  { %100 = vadd.xlane.f32.xlu0 %v99_v48 }
  0x79   :  { %v56_v50 = vpop.xlane.xlu0 %55  ;;  %v62_v51 = vpop.xlane.xlu1 %61 }
  0x7a   :  { %v68_v52 = vpop.xlane.xlu2 %67  ;;  %v103_v53 = vadd.f32 %v401_v49, %v56_v50  ;;  %v105_v55 = vadd.f32 %v401_v49, %v62_v51 }
  0x7b   :  { %v107_v59 = vadd.f32 %v401_v49, %v68_v52  ;;  %v218_v52 = vadd.s32 4294967224, %v405_v57 }
  0x7c   :  { %v135_v56 = vmul.f32 0.1, %v103_v53  ;;  %vm119_vm1 = vcmp.ge.f32.partialorder %v103_v53, 0.0  ;;  %v137_v58 = vmul.f32 0.1, %v105_v55  ;;  %vm121_vm2 = vcmp.ge.f32.partialorder %v105_v55, 0.0 }
  0x7d   :  { %v139_v9 = vmul.f32 0.1, %v107_v59  ;;  %vm123_vm7 = vcmp.ge.f32.partialorder %v107_v59, 0.0 }
  0x7e   :  { %v151_v2 = vsel %vm119_vm1, %v103_v53, %v135_v56  ;;  %v153_v8 = vsel %vm121_vm2, %v105_v55, %v137_v58 }
  0x7f   :  { %v185_v13 = vperm.slane %v151_v2, %v405_v57  ;;  %v191_v16 = vperm.slane %v153_v8, %v190_v62  ;;  %v155_v18 = vsel %vm123_vm7, %v107_v59, %v139_v9 }
  0x80   :  { %v199_v31 = vperm.slane %v155_v18, %v198_v17 }
  0x81   :  { %v59_v60 = vpop.xlane.xlu0 %58  ;;  %v65_v61 = vpop.xlane.xlu1 %64 }
  0x82   :  { %v104_v63 = vadd.f32 %v401_v49, %v59_v60  ;;  %v106_v0 = vadd.f32 %v401_v49, %v65_v61  ;;  %v71_v1 = vpop.xlane.xlu2 %70  ;;  %v222_v60 = vadd.s32 4294967216, %v405_v57 }
  0x83   :  { %v108_v5 = vadd.f32 %v401_v49, %v71_v1  ;;  %v226_v1 = vadd.s32 4294967208, %v405_v57 }
  0x84   :  { %vm120_vm3 = vcmp.ge.f32.partialorder %v104_v63, 0.0  ;;  %v136_v6 = vmul.f32 0.1, %v104_v63  ;;  %vm122_vm4 = vcmp.ge.f32.partialorder %v106_v0, 0.0  ;;  %v138_v7 = vmul.f32 0.1, %v106_v0 }
  0x85   :  { %v140_v12 = vmul.f32 0.1, %v108_v5  ;;  %vm124_vm8 = vcmp.ge.f32.partialorder %v108_v5, 0.0 }
  0x86   :  { %v152_v10 = vsel %vm120_vm3, %v104_v63, %v136_v6  ;;  %v154_v11 = vsel %vm122_vm4, %v106_v0, %v138_v7  ;;  %vm216_vm3 = vcmask 589312  }
  0x87   :  { %v187_v14 = vperm.slane %v152_v10, %v186_v3  ;;  %v195_v15 = vperm.slane %v154_v11, %v194_v4  ;;  %v156_v24 = vsel %vm124_vm8, %v108_v5, %v140_v12  ;;  %v230_v10 = vadd.s32 4294967200, %v405_v57 }
  0x88   :  { %v203_v33 = vperm.slane %v156_v24, %v202_v20 }
  0x89   :  { %v189_v19 = vsel %vm188_vm5, %v187_v14, %v185_v13  ;;  %v74_v21 = vpop.xlane.xlu0 %73  ;;  %v77_v22 = vpop.xlane.xlu1 %76  ;;  %vm220_vm5 = vcmask 654912  }
  0x8a   :  { %v193_v23 = vsel %vm192_vm6, %v191_v16, %v189_v19  ;;  %v109_v25 = vadd.f32 %v401_v49, %v74_v21  ;;  %v110_v26 = vadd.f32 %v401_v49, %v77_v22  ;;  %v80_v27 = vpop.xlane.xlu2 %79  ;;  %vm224_vm6 = vcmask 720512  }
  0x8b   :  { %v197_v28 = vsel %vm196_vm9, %v195_v15, %v193_v23  ;;  %v111_v30 = vadd.f32 %v401_v49, %v80_v27  ;;  %vm228_vm9 = vcmask 786112   ;;  %v234_v15 = vadd.s32 4294967192, %v405_v57 }
  0x8c   :  { %vm125_vm11 = vcmp.ge.f32.partialorder %v109_v25, 0.0  ;;  %v141_v32 = vmul.f32 0.1, %v109_v25  ;;  %vm126_vm12 = vcmp.ge.f32.partialorder %v110_v26, 0.0  ;;  %v142_v34 = vmul.f32 0.1, %v110_v26 }
  0x8d   :  { %v201_v35 = vsel %vm200_vm10, %v199_v31, %v197_v28  ;;  %v143_v38 = vmul.f32 0.1, %v111_v30  ;;  %vm127_vm14 = vcmp.ge.f32.partialorder %v111_v30, 0.0  ;;  %v238_v21 = vadd.s32 4294967184, %v405_v57 }
  0x8e   :  { %v157_v36 = vsel %vm125_vm11, %v109_v25, %v141_v32  ;;  %v158_v40 = vsel %vm126_vm12, %v110_v26, %v142_v34  ;;  %v205_v41 = vsel %vm204_vm13, %v203_v33, %v201_v35  ;;  %vm232_vm11 = vcmask 851712  }
  0x8f   :  { %v207_v39 = vperm.slane %v157_v36, %v206_v29  ;;  %v211_v45 = vperm.slane %v158_v40, %v210_v37  ;;  %v159_v46 = vsel %vm127_vm14, %v111_v30, %v143_v38  ;;  %vm236_vm12 = vcmask 917312  }
  0x90   :  { %v215_v56 = vperm.slane %v159_v46, %v214_v42  ;;  %v242_v28 = vadd.s32 4294967176, %v405_v57  ;;  %vm240_vm14 = vcmask 982912  }
  0x91   :  { %v83_v43 = vpop.xlane.xlu0 %82  ;;  %v86_v44 = vpop.xlane.xlu1 %85  ;;  %v209_v51 = vsel %vm208_vm15, %v207_v39, %v205_v41  ;;  %vm244_vm15 = vcmask 1048512  }
  0x92   :  { %v112_v47 = vadd.f32 %v401_v49, %v83_v43  ;;  %v113_v48 = vadd.f32 %v401_v49, %v86_v44  ;;  %v89_v50 = vpop.xlane.xlu2 %88  ;;  %v213_v58 = vsel %vm212_vm0, %v211_v45, %v209_v51 }
  0x93   :  { %v114_v53 = vadd.f32 %v401_v49, %v89_v50  ;;  %v217_v0 = vsel %vm216_vm3, %v215_v56, %v213_v58 }
  0x94   :  { %vm128_vm1 = vcmp.ge.f32.partialorder %v112_v47, 0.0  ;;  %v144_v54 = vmul.f32 0.1, %v112_v47  ;;  %vm129_vm2 = vcmp.ge.f32.partialorder %v113_v48, 0.0  ;;  %v145_v55 = vmul.f32 0.1, %v113_v48 }
  0x95   :  { %v146_v61 = vmul.f32 0.1, %v114_v53  ;;  %vm130_vm4 = vcmp.ge.f32.partialorder %v114_v53, 0.0 }
  0x96   :  { %v160_v59 = vsel %vm128_vm1, %v112_v47, %v144_v54  ;;  %v161_v63 = vsel %vm129_vm2, %v113_v48, %v145_v55 }
  0x97   :  { %v219_v62 = vperm.slane %v160_v59, %v218_v52  ;;  %v223_v4 = vperm.slane %v161_v63, %v222_v60  ;;  %v162_v5 = vsel %vm130_vm4, %v114_v53, %v146_v61 }
  0x98   :  { %v227_v14 = vperm.slane %v162_v5, %v226_v1 }
  0x99   :  { %v92_v2 = vpop.xlane.xlu0 %91  ;;  %v95_v3 = vpop.xlane.xlu1 %94  ;;  %v221_v9 = vsel %vm220_vm5, %v219_v62, %v217_v0 }
  0x9a   :  { %v115_v6 = vadd.f32 %v401_v49, %v92_v2  ;;  %v116_v7 = vadd.f32 %v401_v49, %v95_v3  ;;  %v98_v8 = vpop.xlane.xlu2 %97  ;;  %v225_v17 = vsel %vm224_vm6, %v223_v4, %v221_v9 }
  0x9b   :  { %v117_v11 = vadd.f32 %v401_v49, %v98_v8  ;;  %v229_v22 = vsel %vm228_vm9, %v227_v14, %v225_v17 }
  0x9c   :  { %vm131_vm7 = vcmp.ge.f32.partialorder %v115_v6, 0.0  ;;  %v147_v12 = vmul.f32 0.1, %v115_v6  ;;  %vm132_vm8 = vcmp.ge.f32.partialorder %v116_v7, 0.0  ;;  %v148_v13 = vmul.f32 0.1, %v116_v7 }
  0x9d   :  { %v149_v16 = vmul.f32 0.1, %v117_v11  ;;  %vm133_vm10 = vcmp.ge.f32.partialorder %v117_v11, 0.0 }
  0x9e   :  { %v163_v18 = vsel %vm131_vm7, %v115_v6, %v147_v12  ;;  %v164_v19 = vsel %vm132_vm8, %v116_v7, %v148_v13 }
  0x9f   :  { %v231_v20 = vperm.slane %v163_v18, %v230_v10  ;;  %v235_v23 = vperm.slane %v164_v19, %v234_v15  ;;  %v165_v24 = vsel %vm133_vm10, %v117_v11, %v149_v16 }
  0xa0   :  { %v239_v29 = vperm.slane %v165_v24, %v238_v21 }
  0xa1   :  { %v101_v25 = vpop.xlane.xlu0 %100  ;;  %v233_v27 = vsel %vm232_vm11, %v231_v20, %v229_v22 }
  0xa2   :  { %v118_v26 = vadd.f32 %v401_v49, %v101_v25  ;;  %v237_v31 = vsel %vm236_vm12, %v235_v23, %v233_v27 }
  0xa3   :  { %v241_v34 = vsel %vm240_vm14, %v239_v29, %v237_v31 }
  0xa4   :  { %vm134_vm13 = vcmp.ge.f32.partialorder %v118_v26, 0.0  ;;  %v150_v30 = vmul.f32 0.1, %v118_v26 }
  0xa6   :  { %v166_v32 = vsel %vm134_vm13, %v118_v26, %v150_v30 }
  0xa7   :  { %v243_v33 = vperm.slane %v166_v32, %v242_v28 }
  0xa9   :  { %v245_v49 = vsel %vm244_vm15, %v243_v33, %v241_v34 }
  0xaa   :  { %247 = vst [vmem:[#allocation3] sm:$0x1] %v245_v49 }
  0xab   :  { %258 = dma.vmem_to_hbm [thread:$0]  %s254_s2, 16, %s256_s1, [#allocation4]  }
  0xac   :  { %290 = dma.done.wait [#allocation4], 16  }
  0xad   :  { %291 = vsyncadd [#allocation4], 4294967280 }
  0xae   :  { %263 = vsyncpa [#allocation4], 1 }

</bundles_post_ra>
